<compile_context>
chip_gen: v7x
topology: tpu7x:2x2x1
jax: 0.10.0
libtpu: 0.0.40
codegen_flags: <defaults>
</compile_context>

<pallas_src>
import math

import jax
import jax.numpy as jnp
from jax import lax
from jax.experimental import pallas as pl
from jax.experimental.pallas import tpu as pltpu  # noqa: F401  (TPU target)

# ---- small, module-consistent shapes ----
B, S, C = 2, 8, 32          # batch, seq, config.channels
HEADS = 4                    # config.heads
HEAD_DIM = C // HEADS        # 8
R = 4 * C                    # config.residual_channels = 128
M = B * S                    # flattened rows = 16
G = HEADS * B                # attention batch dim (head-major, then batch) = 8
EPS = 1e-5                   # torch LayerNorm default eps


def _layernorm(v, g, b):
    mu = jnp.mean(v, axis=-1, keepdims=True)
    var = jnp.mean((v - mu) ** 2, axis=-1, keepdims=True)
    return (v - mu) * lax.rsqrt(var + EPS) * g + b


def _gelu(v):
    # exact (erf) GELU, matching torch.nn.GELU default
    return 0.5 * v * (1.0 + lax.erf(v * (1.0 / math.sqrt(2.0))))


def transformer_block_kernel(
    x_ref,      # (M, C)      flattened input
    wqkv_ref,   # (C, 3C)     fused [wq*scale | wk | wv]
    wo_ref,     # (C, C)      original output projection
    w1_ref,     # (C, R)
    w2_ref,     # (R, C)
    vec_ref,    # (6, C)      [ln1_g, ln1_b, bo, ln2_g, ln2_b, b2]
    brow_ref,   # (2, R)      row0 = b1 ; row1[:3C] = [bq*scale | bk | bv]
    o_ref,      # (M, C)
):
    x = x_ref[...]                                     # (M, C)

    ln1_g = vec_ref[0:1, :]
    ln1_b = vec_ref[1:2, :]
    bo = vec_ref[2:3, :]
    ln2_g = vec_ref[3:4, :]
    ln2_b = vec_ref[4:5, :]
    b2 = vec_ref[5:6, :]
    b1 = brow_ref[0:1, :]                              # (1, R)
    bqkv = brow_ref[1:2, 0:3 * C]                      # (1, 3C)

    # ---- attention branch: x + Attn(LN(x)), self-attention (xk = xv = None) ----
    xq = _layernorm(x, ln1_g, ln1_b)                   # (M, C)
    qkv = jnp.dot(xq, wqkv_ref[...],
                  preferred_element_type=jnp.float32) + bqkv   # (M, 3C), one MXU push

    # Free reshape: split the sublane-major M dim on the 8-row boundary.
    qkv3 = qkv.reshape(B, S, 3 * C)                    # (B, S, 3C)

    def head_batched(base):
        # (B, S, 3C) -> (H*B, S, D): static 8-lane slices + leading-axis concat.
        return jnp.concatenate(
            [qkv3[:, :, base + h * HEAD_DIM: base + (h + 1) * HEAD_DIM]
             for h in range(HEADS)],
            axis=0)

    q = head_batched(0)                                # (G, S, D), already /sqrt(D)
    k = head_batched(C)
    v = head_batched(2 * C)

    # batched scores: no cross-batch quadrants, no mask needed
    dn_qk = (((2,), (2,)), ((0,), (0,)))               # (G,S,D)x(G,S,D)->(G,S,S)
    s = lax.dot_general(q, k, dn_qk, preferred_element_type=jnp.float32)
    s = s - jnp.max(s, axis=-1, keepdims=True)
    e = jnp.exp(s)
    p = e * pl.reciprocal(jnp.sum(e, axis=-1, keepdims=True), approx=True)
    # attention_dropout: eval mode -> identity

    dn_pv = (((2,), (1,)), ((0,), (0,)))               # (G,S,S)x(G,S,D)->(G,S,D)
    ctx = lax.dot_general(p, v, dn_pv, preferred_element_type=jnp.float32)

    # repack (H*B, S, D) -> (M, C): per-head (B,S,D)->(M,D) (free major reshape),
    # then lane-axis concat in head-major column order (matches wo row order).
    ctx2d = jnp.concatenate(
        [ctx[h * B:(h + 1) * B].reshape(M, HEAD_DIM) for h in range(HEADS)],
        axis=-1)                                       # (M, C)

    att = jnp.dot(ctx2d, wo_ref[...],
                  preferred_element_type=jnp.float32) + bo     # single (M,C)x(C,C)
    # content_dropout: eval mode -> identity
    x1 = x + att

    # ---- projection residual branch: x1 + MLP(LN(x1)) ----
    h = _layernorm(x1, ln2_g, ln2_b)
    h = jnp.dot(h, w1_ref[...], preferred_element_type=jnp.float32) + b1
    h = _gelu(h)                                       # make_nonlinearity -> GELU
    h = jnp.dot(h, w2_ref[...], preferred_element_type=jnp.float32) + b2
    # residual_dropout: eval mode -> identity
    o_ref[...] = x1 + h


def transformer_block(x, params):
    # Host-side packing (free XLA work, done once):
    #   * fused qkv weight with the attention scale folded into the q columns,
    #   * fused qkv bias packed alongside b1 into a single (2, R) row array,
    #   * the six C-wide vectors packed into one (6, C) array.
    scale = 1.0 / math.sqrt(HEAD_DIM)
    wqkv = jnp.concatenate(
        [params["wq"] * scale, params["wk"], params["wv"]], axis=1)   # (C, 3C)
    bqkv = jnp.concatenate(
        [params["bq"] * scale, params["bk"], params["bv"]], axis=1)   # (1, 3C)
    brow = jnp.concatenate(
        [params["b1"], jnp.pad(bqkv, ((0, 0), (0, R - 3 * C)))], axis=0)  # (2, R)
    vecC = jnp.concatenate(
        [params["ln1_g"], params["ln1_b"], params["bo"],
         params["ln2_g"], params["ln2_b"], params["b2"]], axis=0)     # (6, C)

    x2d = x.reshape(M, C)    # fold batch into the matmul M dimension

    # TODO(synk): at production shapes, add a leading "parallel" grid axis over
    # M row-tiles (constant index_maps for weights) for v7x's 2nd TensorCore and
    # set pltpu.CompilerParams(vmem_limit_bytes=...) against v7x's 64 MiB VMEM.
    out2d = pl.pallas_call(
        transformer_block_kernel,
        out_shape=jax.ShapeDtypeStruct((M, C), jnp.float32),
        # grid=() : single invocation, all 7 inputs resident in VMEM (<1 MiB).
    )(x2d, wqkv, params["wo"], params["w1"], params["w2"], vecC, brow)

    return out2d.reshape(B, S, C)


def _reference(x, p):
    def ln(v, g, b):
        mu = jnp.mean(v, axis=-1, keepdims=True)
        var = jnp.mean((v - mu) ** 2, axis=-1, keepdims=True)
        return (v - mu) / jnp.sqrt(var + EPS) * g[0] + b[0]

    xq = ln(x, p["ln1_g"], p["ln1_b"])
    q = xq @ p["wq"] + p["bq"][0]
    k = xq @ p["wk"] + p["bk"][0]
    v = xq @ p["wv"] + p["bv"][0]
    q = q.reshape(B, S, HEADS, HEAD_DIM)
    k = k.reshape(B, S, HEADS, HEAD_DIM)
    v = v.reshape(B, S, HEADS, HEAD_DIM)
    s = jnp.einsum("bqhd,bkhd->bhqk", q, k) / math.sqrt(HEAD_DIM)
    pmat = jax.nn.softmax(s, axis=-1)
    att = jnp.einsum("bhqk,bkhd->bqhd", pmat, v).reshape(B, S, C)
    att = att @ p["wo"] + p["bo"][0]
    x1 = x + att
    h = ln(x1, p["ln2_g"], p["ln2_b"])
    h = h @ p["w1"] + p["b1"][0]
    h = 0.5 * h * (1.0 + lax.erf(h / math.sqrt(2.0)))
    h = h @ p["w2"] + p["b2"][0]
    return x1 + h


if __name__ == "__main__":
    key = jax.random.PRNGKey(0)
    ks = jax.random.split(key, 16)

    def lin(kw, kb, din, dout):
        return (0.02 * jax.random.normal(kw, (din, dout), jnp.float32),
                0.02 * jax.random.normal(kb, (1, dout), jnp.float32))

    wq, bq = lin(ks[1], ks[2], C, C)
    wk, bk = lin(ks[3], ks[4], C, C)
    wv, bv = lin(ks[5], ks[6], C, C)
    wo, bo = lin(ks[7], ks[8], C, C)
    w1, b1 = lin(ks[9], ks[10], C, R)
    w2, b2 = lin(ks[11], ks[12], R, C)

    params = dict(
        ln1_g=jnp.ones((1, C), jnp.float32), ln1_b=jnp.zeros((1, C), jnp.float32),
        wq=wq, bq=bq, wk=wk, bk=bk, wv=wv, bv=bv, wo=wo, bo=bo,
        ln2_g=jnp.ones((1, C), jnp.float32), ln2_b=jnp.zeros((1, C), jnp.float32),
        w1=w1, b1=b1, w2=w2, b2=b2,
    )

    x = jax.random.normal(ks[0], (B, S, C), jnp.float32)

    out = transformer_block(x, params)
    jax.block_until_ready(out)

    ref = _reference(x, params)
    assert out.shape == (B, S, C)
    assert jnp.allclose(out, ref, atol=1e-3, rtol=1e-3)

    print("KERNEL_OK")
</pallas_src>

<mosaic_0001>
module attributes {stable_mosaic.version = 11 : i64} {
  func.func @transformer_block_kernel(%arg0: memref<16x32xf32, #tpu.memory_space<vmem>>, %arg1: memref<32x96xf32, #tpu.memory_space<vmem>>, %arg2: memref<32x32xf32, #tpu.memory_space<vmem>>, %arg3: memref<32x128xf32, #tpu.memory_space<vmem>>, %arg4: memref<128x32xf32, #tpu.memory_space<vmem>>, %arg5: memref<6x32xf32, #tpu.memory_space<vmem>>, %arg6: memref<2x128xf32, #tpu.memory_space<vmem>>, %arg7: memref<16x32xf32, #tpu.memory_space<vmem>>) attributes {dimension_semantics = [], scalar_prefetch = 0 : i64, scratch_operands = 0 : i64, tpu.core_type = #tpu.core_type<tc>} {
    %c0 = arith.constant 0 : index
    %c0_0 = arith.constant 0 : index
    %0 = vector.load %arg0[%c0, %c0_0] : memref<16x32xf32, #tpu.memory_space<vmem>>, vector<16x32xf32>
    %c0_1 = arith.constant 0 : index
    %c0_2 = arith.constant 0 : index
    %1 = vector.load %arg5[%c0_1, %c0_2] : memref<6x32xf32, #tpu.memory_space<vmem>>, vector<1x32xf32>
    %c1 = arith.constant 1 : index
    %c0_3 = arith.constant 0 : index
    %2 = vector.load %arg5[%c1, %c0_3] : memref<6x32xf32, #tpu.memory_space<vmem>>, vector<1x32xf32>
    %c2 = arith.constant 2 : index
    %c0_4 = arith.constant 0 : index
    %3 = vector.load %arg5[%c2, %c0_4] : memref<6x32xf32, #tpu.memory_space<vmem>>, vector<1x32xf32>
    %c3 = arith.constant 3 : index
    %c0_5 = arith.constant 0 : index
    %4 = vector.load %arg5[%c3, %c0_5] : memref<6x32xf32, #tpu.memory_space<vmem>>, vector<1x32xf32>
    %c4 = arith.constant 4 : index
    %c0_6 = arith.constant 0 : index
    %5 = vector.load %arg5[%c4, %c0_6] : memref<6x32xf32, #tpu.memory_space<vmem>>, vector<1x32xf32>
    %c5 = arith.constant 5 : index
    %c0_7 = arith.constant 0 : index
    %6 = vector.load %arg5[%c5, %c0_7] : memref<6x32xf32, #tpu.memory_space<vmem>>, vector<1x32xf32>
    %c0_8 = arith.constant 0 : index
    %c0_9 = arith.constant 0 : index
    %7 = vector.load %arg6[%c0_8, %c0_9] : memref<2x128xf32, #tpu.memory_space<vmem>>, vector<1x128xf32>
    %c1_10 = arith.constant 1 : index
    %c0_11 = arith.constant 0 : index
    %8 = vector.load %arg6[%c1_10, %c0_11] : memref<2x128xf32, #tpu.memory_space<vmem>>, vector<1x96xf32>
    %cst = arith.constant dense<0.000000e+00> : vector<16xf32>
    %9 = vector.multi_reduction <add>, %0, %cst [1] : vector<16x32xf32> to vector<16xf32>
    %10 = vector.shape_cast %9 : vector<16xf32> to vector<16x1xf32>
    %cst_12 = arith.constant 3.200000e+01 : f32
    %11 = vector.broadcast %cst_12 : f32 to vector<16x1xf32>
    %12 = arith.divf %10, %11 : vector<16x1xf32>
    %13 = vector.broadcast %12 : vector<16x1xf32> to vector<16x32xf32>
    %14 = arith.subf %0, %13 : vector<16x32xf32>
    %15 = arith.mulf %14, %14 : vector<16x32xf32>
    %cst_13 = arith.constant dense<0.000000e+00> : vector<16xf32>
    %16 = vector.multi_reduction <add>, %15, %cst_13 [1] : vector<16x32xf32> to vector<16xf32>
    %17 = vector.shape_cast %16 : vector<16xf32> to vector<16x1xf32>
    %cst_14 = arith.constant 3.200000e+01 : f32
    %18 = vector.broadcast %cst_14 : f32 to vector<16x1xf32>
    %19 = arith.divf %17, %18 : vector<16x1xf32>
    %20 = vector.broadcast %12 : vector<16x1xf32> to vector<16x32xf32>
    %21 = arith.subf %0, %20 : vector<16x32xf32>
    %cst_15 = arith.constant 9.99999974E-6 : f32
    %22 = vector.broadcast %cst_15 : f32 to vector<16x1xf32>
    %23 = arith.addf %19, %22 : vector<16x1xf32>
    %24 = math.rsqrt %23 : vector<16x1xf32>
    %25 = vector.broadcast %24 : vector<16x1xf32> to vector<16x32xf32>
    %26 = arith.mulf %21, %25 : vector<16x32xf32>
    %27 = vector.broadcast %1 : vector<1x32xf32> to vector<16x32xf32>
    %28 = arith.mulf %26, %27 : vector<16x32xf32>
    %29 = vector.broadcast %2 : vector<1x32xf32> to vector<16x32xf32>
    %30 = arith.addf %28, %29 : vector<16x32xf32>
    %c0_16 = arith.constant 0 : index
    %c0_17 = arith.constant 0 : index
    %31 = vector.load %arg1[%c0_16, %c0_17] : memref<32x96xf32, #tpu.memory_space<vmem>>, vector<32x96xf32>
    %cst_18 = arith.constant dense<0.000000e+00> : vector<16x96xf32>
    %32 = tpu.matmul %30, %31, %cst_18 {dimension_numbers = #tpu.dot_dimension_numbers<[1], [0], [0], [1], [0, 0, 1, 1], [], []>} : vector<16x32xf32>, vector<32x96xf32>, vector<16x96xf32> -> vector<16x96xf32>
    %33 = vector.broadcast %8 : vector<1x96xf32> to vector<16x96xf32>
    %34 = arith.addf %32, %33 : vector<16x96xf32>
    %35 = vector.shape_cast %34 : vector<16x96xf32> to vector<2x8x96xf32>
    %36 = vector.extract_strided_slice %35 {offsets = [0, 0, 0], sizes = [2, 8, 8], strides = [1, 1, 1]} : vector<2x8x96xf32> to vector<2x8x8xf32>
    %37 = vector.extract_strided_slice %35 {offsets = [0, 0, 8], sizes = [2, 8, 8], strides = [1, 1, 1]} : vector<2x8x96xf32> to vector<2x8x8xf32>
    %38 = vector.extract_strided_slice %35 {offsets = [0, 0, 16], sizes = [2, 8, 8], strides = [1, 1, 1]} : vector<2x8x96xf32> to vector<2x8x8xf32>
    %39 = vector.extract_strided_slice %35 {offsets = [0, 0, 24], sizes = [2, 8, 8], strides = [1, 1, 1]} : vector<2x8x96xf32> to vector<2x8x8xf32>
    %40 = tpu.concatenate %36, %37, %38, %39 in 0 : vector<2x8x8xf32>, vector<2x8x8xf32>, vector<2x8x8xf32>, vector<2x8x8xf32> -> vector<8x8x8xf32>
    %41 = vector.extract_strided_slice %35 {offsets = [0, 0, 32], sizes = [2, 8, 8], strides = [1, 1, 1]} : vector<2x8x96xf32> to vector<2x8x8xf32>
    %42 = vector.extract_strided_slice %35 {offsets = [0, 0, 40], sizes = [2, 8, 8], strides = [1, 1, 1]} : vector<2x8x96xf32> to vector<2x8x8xf32>
    %43 = vector.extract_strided_slice %35 {offsets = [0, 0, 48], sizes = [2, 8, 8], strides = [1, 1, 1]} : vector<2x8x96xf32> to vector<2x8x8xf32>
    %44 = vector.extract_strided_slice %35 {offsets = [0, 0, 56], sizes = [2, 8, 8], strides = [1, 1, 1]} : vector<2x8x96xf32> to vector<2x8x8xf32>
    %45 = tpu.concatenate %41, %42, %43, %44 in 0 : vector<2x8x8xf32>, vector<2x8x8xf32>, vector<2x8x8xf32>, vector<2x8x8xf32> -> vector<8x8x8xf32>
    %46 = vector.extract_strided_slice %35 {offsets = [0, 0, 64], sizes = [2, 8, 8], strides = [1, 1, 1]} : vector<2x8x96xf32> to vector<2x8x8xf32>
    %47 = vector.extract_strided_slice %35 {offsets = [0, 0, 72], sizes = [2, 8, 8], strides = [1, 1, 1]} : vector<2x8x96xf32> to vector<2x8x8xf32>
    %48 = vector.extract_strided_slice %35 {offsets = [0, 0, 80], sizes = [2, 8, 8], strides = [1, 1, 1]} : vector<2x8x96xf32> to vector<2x8x8xf32>
    %49 = vector.extract_strided_slice %35 {offsets = [0, 0, 88], sizes = [2, 8, 8], strides = [1, 1, 1]} : vector<2x8x96xf32> to vector<2x8x8xf32>
    %50 = tpu.concatenate %46, %47, %48, %49 in 0 : vector<2x8x8xf32>, vector<2x8x8xf32>, vector<2x8x8xf32>, vector<2x8x8xf32> -> vector<8x8x8xf32>
    %cst_19 = arith.constant dense<0.000000e+00> : vector<8x8x8xf32>
    %51 = tpu.matmul %40, %45, %cst_19 {dimension_numbers = #tpu.dot_dimension_numbers<[2], [2], [1], [1], [0, 0, 0, 1, 1, 1], [0], [0]>} : vector<8x8x8xf32>, vector<8x8x8xf32>, vector<8x8x8xf32> -> vector<8x8x8xf32>
    %cst_20 = arith.constant dense<0xFF800000> : vector<8x8xf32>
    %52 = vector.multi_reduction <maximumf>, %51, %cst_20 [2] : vector<8x8x8xf32> to vector<8x8xf32>
    %53 = vector.shape_cast %52 : vector<8x8xf32> to vector<8x8x1xf32>
    %54 = vector.broadcast %53 : vector<8x8x1xf32> to vector<8x8x8xf32>
    %55 = arith.subf %51, %54 : vector<8x8x8xf32>
    %56 = math.exp %55 : vector<8x8x8xf32>
    %cst_21 = arith.constant dense<0.000000e+00> : vector<8x8xf32>
    %57 = vector.multi_reduction <add>, %56, %cst_21 [2] : vector<8x8x8xf32> to vector<8x8xf32>
    %58 = vector.shape_cast %57 : vector<8x8xf32> to vector<8x8x1xf32>
    %59 = tpu.reciprocal %58 {approx = true} : vector<8x8x1xf32> -> vector<8x8x1xf32>
    %60 = vector.broadcast %59 : vector<8x8x1xf32> to vector<8x8x8xf32>
    %61 = arith.mulf %56, %60 : vector<8x8x8xf32>
    %cst_22 = arith.constant dense<0.000000e+00> : vector<8x8x8xf32>
    %62 = tpu.matmul %61, %50, %cst_22 {dimension_numbers = #tpu.dot_dimension_numbers<[2], [1], [1], [2], [0, 0, 0, 1, 1, 2], [0], [0]>} : vector<8x8x8xf32>, vector<8x8x8xf32>, vector<8x8x8xf32> -> vector<8x8x8xf32>
    %63 = vector.extract_strided_slice %62 {offsets = [0, 0, 0], sizes = [2, 8, 8], strides = [1, 1, 1]} : vector<8x8x8xf32> to vector<2x8x8xf32>
    %64 = vector.shape_cast %63 : vector<2x8x8xf32> to vector<16x8xf32>
    %65 = vector.extract_strided_slice %62 {offsets = [2, 0, 0], sizes = [2, 8, 8], strides = [1, 1, 1]} : vector<8x8x8xf32> to vector<2x8x8xf32>
    %66 = vector.shape_cast %65 : vector<2x8x8xf32> to vector<16x8xf32>
    %67 = vector.extract_strided_slice %62 {offsets = [4, 0, 0], sizes = [2, 8, 8], strides = [1, 1, 1]} : vector<8x8x8xf32> to vector<2x8x8xf32>
    %68 = vector.shape_cast %67 : vector<2x8x8xf32> to vector<16x8xf32>
    %69 = vector.extract_strided_slice %62 {offsets = [6, 0, 0], sizes = [2, 8, 8], strides = [1, 1, 1]} : vector<8x8x8xf32> to vector<2x8x8xf32>
    %70 = vector.shape_cast %69 : vector<2x8x8xf32> to vector<16x8xf32>
    %71 = tpu.concatenate %64, %66, %68, %70 in 1 : vector<16x8xf32>, vector<16x8xf32>, vector<16x8xf32>, vector<16x8xf32> -> vector<16x32xf32>
    %c0_23 = arith.constant 0 : index
    %c0_24 = arith.constant 0 : index
    %72 = vector.load %arg2[%c0_23, %c0_24] : memref<32x32xf32, #tpu.memory_space<vmem>>, vector<32x32xf32>
    %cst_25 = arith.constant dense<0.000000e+00> : vector<16x32xf32>
    %73 = tpu.matmul %71, %72, %cst_25 {dimension_numbers = #tpu.dot_dimension_numbers<[1], [0], [0], [1], [0, 0, 1, 1], [], []>} : vector<16x32xf32>, vector<32x32xf32>, vector<16x32xf32> -> vector<16x32xf32>
    %74 = vector.broadcast %3 : vector<1x32xf32> to vector<16x32xf32>
    %75 = arith.addf %73, %74 : vector<16x32xf32>
    %76 = arith.addf %0, %75 : vector<16x32xf32>
    %cst_26 = arith.constant dense<0.000000e+00> : vector<16xf32>
    %77 = vector.multi_reduction <add>, %76, %cst_26 [1] : vector<16x32xf32> to vector<16xf32>
    %78 = vector.shape_cast %77 : vector<16xf32> to vector<16x1xf32>
    %cst_27 = arith.constant 3.200000e+01 : f32
    %79 = vector.broadcast %cst_27 : f32 to vector<16x1xf32>
    %80 = arith.divf %78, %79 : vector<16x1xf32>
    %81 = vector.broadcast %80 : vector<16x1xf32> to vector<16x32xf32>
    %82 = arith.subf %76, %81 : vector<16x32xf32>
    %83 = arith.mulf %82, %82 : vector<16x32xf32>
    %cst_28 = arith.constant dense<0.000000e+00> : vector<16xf32>
    %84 = vector.multi_reduction <add>, %83, %cst_28 [1] : vector<16x32xf32> to vector<16xf32>
    %85 = vector.shape_cast %84 : vector<16xf32> to vector<16x1xf32>
    %cst_29 = arith.constant 3.200000e+01 : f32
    %86 = vector.broadcast %cst_29 : f32 to vector<16x1xf32>
    %87 = arith.divf %85, %86 : vector<16x1xf32>
    %88 = vector.broadcast %80 : vector<16x1xf32> to vector<16x32xf32>
    %89 = arith.subf %76, %88 : vector<16x32xf32>
    %cst_30 = arith.constant 9.99999974E-6 : f32
    %90 = vector.broadcast %cst_30 : f32 to vector<16x1xf32>
    %91 = arith.addf %87, %90 : vector<16x1xf32>
    %92 = math.rsqrt %91 : vector<16x1xf32>
    %93 = vector.broadcast %92 : vector<16x1xf32> to vector<16x32xf32>
    %94 = arith.mulf %89, %93 : vector<16x32xf32>
    %95 = vector.broadcast %4 : vector<1x32xf32> to vector<16x32xf32>
    %96 = arith.mulf %94, %95 : vector<16x32xf32>
    %97 = vector.broadcast %5 : vector<1x32xf32> to vector<16x32xf32>
    %98 = arith.addf %96, %97 : vector<16x32xf32>
    %c0_31 = arith.constant 0 : index
    %c0_32 = arith.constant 0 : index
    %99 = vector.load %arg3[%c0_31, %c0_32] : memref<32x128xf32, #tpu.memory_space<vmem>>, vector<32x128xf32>
    %cst_33 = arith.constant dense<0.000000e+00> : vector<16x128xf32>
    %100 = tpu.matmul %98, %99, %cst_33 {dimension_numbers = #tpu.dot_dimension_numbers<[1], [0], [0], [1], [0, 0, 1, 1], [], []>} : vector<16x32xf32>, vector<32x128xf32>, vector<16x128xf32> -> vector<16x128xf32>
    %101 = vector.broadcast %7 : vector<1x128xf32> to vector<16x128xf32>
    %102 = arith.addf %100, %101 : vector<16x128xf32>
    %cst_34 = arith.constant 5.000000e-01 : f32
    %103 = vector.broadcast %cst_34 : f32 to vector<16x128xf32>
    %104 = arith.mulf %103, %102 : vector<16x128xf32>
    %cst_35 = arith.constant 0.707106769 : f32
    %105 = vector.broadcast %cst_35 : f32 to vector<16x128xf32>
    %106 = arith.mulf %102, %105 : vector<16x128xf32>
    %107 = math.erf %106 : vector<16x128xf32>
    %cst_36 = arith.constant 1.000000e+00 : f32
    %108 = vector.broadcast %cst_36 : f32 to vector<16x128xf32>
    %109 = arith.addf %108, %107 : vector<16x128xf32>
    %110 = arith.mulf %104, %109 : vector<16x128xf32>
    %c0_37 = arith.constant 0 : index
    %c0_38 = arith.constant 0 : index
    %111 = vector.load %arg4[%c0_37, %c0_38] : memref<128x32xf32, #tpu.memory_space<vmem>>, vector<128x32xf32>
    %cst_39 = arith.constant dense<0.000000e+00> : vector<16x32xf32>
    %112 = tpu.matmul %110, %111, %cst_39 {dimension_numbers = #tpu.dot_dimension_numbers<[1], [0], [0], [1], [0, 0, 1, 1], [], []>} : vector<16x128xf32>, vector<128x32xf32>, vector<16x32xf32> -> vector<16x32xf32>
    %113 = vector.broadcast %6 : vector<1x32xf32> to vector<16x32xf32>
    %114 = arith.addf %112, %113 : vector<16x32xf32>
    %115 = arith.addf %76, %114 : vector<16x32xf32>
    %c0_40 = arith.constant 0 : index
    %c0_41 = arith.constant 0 : index
    %116 = vector.load %arg7[%c0_40, %c0_41] : memref<16x32xf32, #tpu.memory_space<vmem>>, vector<16x32xf32>
    tpu.vector_store %arg7[%c0_40, %c0_41], %115 {strides = array<i32>} : memref<16x32xf32, #tpu.memory_space<vmem>>, vector<16x32xf32>,
    return
  }
}

</mosaic_0001>

<bundles_post_ra>
// kernel: tpu_custom_call.1
= control target key start
LH: loop header
LB: loop body
LE: loop exit
PB: predicated region body
PF: predicated region fallthrough
CT: control target
= control target key end

     0   :  { %vm37_vm0 = vcmask 261120   ;;  %s2627_s0 = inlined_call_operand.vmem [shape: f32[16,32], index: 0, kind: input, shape index: {}]   ;;  %s2628_s1 = inlined_call_operand.vmem [shape: f32[32,96], index: 1, kind: input, shape index: {}]   ;;  %s2629_s2 = inlined_call_operand.vmem [shape: f32[32,32], index: 2, kind: input, shape index: {}]   ;;  %s2630_s3 = inlined_call_operand.vmem [shape: f32[32,128], index: 3, kind: input, shape index: {}]   ;;  %s2631_s4 = inlined_call_operand.vmem [shape: f32[128,32], index: 4, kind: input, shape index: {}]   ;;  %s2632_s5 = inlined_call_operand.vmem [shape: f32[6,32], index: 5, kind: input, shape index: {}]   ;;  %s2633_s6 = inlined_call_operand.vmem [shape: f32[2,128], index: 6, kind: input, shape index: {}]   ;;  %s2634_s7 = inlined_call_operand.hbm [shape: f32[16,32], index: 7, kind: output, shape index: {}]  }
   0x1   :  { %v2305_v0 = vld [vmem:[%s2627_s0] sm:$0xff]  ;;  %v2310_v1 = vld [vmem:[%s2627_s0 + $0x8] sm:$0xff] }
   0x2   :  { %12 = vsyncpa [#allocation3], 0  ;;  %v38_v2 = vsel %vm37_vm0, %v2305_v0, 0.0  ;;  %v41_v3 = vsel %vm37_vm0, %v2310_v1, 0.0  ;;  %v77_v14 = vld [vmem:[%s2628_s1] sm:$0xff]  ;;  %v78_v15 = vld [vmem:[%s2628_s1 + $0x8] sm:$0xff] }
   0x3   :  { %39 = vadd.xlane.f32.xlu0 %v38_v2  ;;  %v79_v16 = vld [vmem:[%s2628_s1 + $0x10] sm:$0xff]  ;;  %v2114_v17 = vpack.c.bf16 %v78_v15, %v77_v14  ;;  %v80_v18 = vld [vmem:[%s2628_s1 + $0x18] sm:$0xff]  ;;  %v1860_v27 = vld [vmem:[%s2632_s5] ss:$0 sm:$0xff]  ;;  %v2250_v37 = vmov 0.0   ;;  %vm2251_vm1 = vmmov 0  }
   0x4   :  { %v2118_v19 = vpack.c.bf16 %v80_v18, %v79_v16  ;;  %v1861_v29 = vld [vmem:[%s2632_s5 + $0x1] ss:$0 sm:$0xff]  ;;  %1987 = vmatprep.subr.mxu0 %v2250_v37  ;;  %1989 = vmatprep.mubr.msk.f32.mxu0 %vm2251_vm1, %v2250_v37  ;;  %s2252_s17 = smov 120   ;;  %s2253_s18 = smov 112   ;;  %vm182_vm2 = vcmask 64512   ;;  %vm1511_vm3 = vcmask 130048  }
   0x5   :  { %2115 = vmatprep.subr.bf16.mxu1 %v2114_v17  ;;  %v1862_v36 = vld [vmem:[%s2633_s6 + $0x1] ss:$0 sm:$0xff]  ;;  %s2254_s19 = smov 104   ;;  %s2255_s20 = smov 96   ;;  %vm1514_vm4 = vcmask 195584  }
   0x6   :  { %2117 = vmatpush3.bf16.msra.mxu1 %v2114_v17  ;;  %s2256_s21 = smov 64   ;;  %s2257_s29 = smov 8  }
   0x7   :  { %42 = vadd.xlane.f32.xlu0 %v41_v3  ;;  %2119 = vmatprep.subr.bf16.mxu1 %v2118_v19  ;;  %s2258_s30 = smov 16   ;;  %s2260_s0 = smov [#allocation2]  }
   0x8   :  { %s1849_s28 = sshll.u32 %s2260_s0, 4  ;;  %s1850_s28 = int_to_ptr.vmem [resolvable:$true] %s1849_s28 }
   0x9   :  { %p2231_p1 = scmp.lt.s32.totalorder %s1850_s28, %s1850_s28 }
   0xa   :  { %2121 = vmatpush3.bf16.msra.mxu1 %v2118_v19 }
   0xb   :  { %1977 = vmatprep.subr.mxu1 %v2250_v37 }
  0x90   :  { %v40_v4 = vpop.xlane.xlu0 %39 }
  0x91   :  { %v45_v5 = vmul.f32 0.03125, %v40_v4 }
  0x93   :  { %v47_v6 = vsub.f32 %v2305_v0, %v45_v5 }
  0x94   :  { %v43_v7 = vpop.xlane.xlu0 %42 }
  0x95   :  { %v46_v8 = vmul.f32 0.03125, %v43_v7  ;;  %v49_v9 = vmul.f32 %v47_v6, %v47_v6 }
  0x97   :  { %v48_v10 = vsub.f32 %v2310_v1, %v46_v8  ;;  %v51_v11 = vsel %vm37_vm0, %v49_v9, 0.0 }
  0x98   :  { %52 = vadd.xlane.f32.xlu1 %v51_v11 }
  0x99   :  { %v50_v12 = vmul.f32 %v48_v10, %v48_v10 }
  0x9b   :  { %v54_v13 = vsel %vm37_vm0, %v50_v12, 0.0 }
  0x9c   :  { %55 = vadd.xlane.f32.xlu1 %v54_v13 }
 0x125   :  { %v53_v20 = vpop.xlane.xlu1 %52 }
 0x126   :  { %v57_v21 = vmul.f32 0.03125, %v53_v20 }
 0x128   :  { %v59_v22 = vadd.f32 1e-05, %v57_v21 }
 0x129   :  { %v56_v23 = vpop.xlane.xlu1 %55 }
 0x12a   :  { %2182 = vrsqrt.f32 %v59_v22  ;;  %v58_v24 = vmul.f32 0.03125, %v56_v23 }
 0x12c   :  { %v60_v25 = vadd.f32 1e-05, %v58_v24 }
 0x12e   :  { %2184 = vrsqrt.f32 %v60_v25 }
 0x134   :  { %v2183_v26 = vpop.eup %2182 }
 0x135   :  { %v63_v28 = vmul.f32 %v2183_v26, %v47_v6 }
 0x137   :  { %v69_v30 = vmul.f32 %v1860_v27, %v63_v28 }
 0x138   :  { %v2185_v31 = vpop.eup %2184 }
 0x139   :  { %v64_v32 = vmul.f32 %v2185_v31, %v48_v10  ;;  %v75_v33 = vadd.f32 %v1861_v29, %v69_v30 }
 0x13b   :  { %v70_v34 = vmul.f32 %v1860_v27, %v64_v32  ;;  %1974 = vmatprep.mubr.msk.f32.mxu1 %vm37_vm0, %v75_v33 }
 0x13d   :  { %v76_v35 = vadd.f32 %v1861_v29, %v70_v34 }
 0x13f   :  { %1975 = vmatmul.mubr.msk.f32.vlgmr.msra.gmra.mrb[0].mxu1 %vm37_vm0, %v76_v35 }
 0x140   :  { %1979 = vmatprep.mubr.msk.f32.mxu1 %vm2251_vm1, %v2250_v37 }
 0x212   :  { %v1976_v38 = vpop.f32.mrb[0].mxu1 }
 0x213   :  { %v2349_v39 = vadd.f32 %v1976_v38, %v1862_v36  ;;  %v157_v40 = vpop.f32.mrb[1].mxu1 }
 0x214   :  { %v2351_v41 = vadd.f32 %v1862_v36, %v157_v40 }
 0x215   :  { %170 = vrot.lane.b32.xlu1 %v2349_v39, %s2252_s17 }
 0x216   :  { %168 = vrot.lane.b32.xlu0 %v2351_v41, %s2252_s17 }
 0x219   :  { %172 = vrot.lane.b32.xlu1 %v2351_v41, %s2253_s18 }
 0x21a   :  { %176 = vrot.lane.b32.xlu0 %v2351_v41, %s2254_s19 }
 0x21d   :  { %174 = vrot.lane.b32.xlu1 %v2349_v39, %s2253_s18 }
 0x21e   :  { %180 = vrot.lane.b32.xlu0 %v2351_v41, %s2255_s20 }
 0x221   :  { %178 = vrot.lane.b32.xlu1 %v2349_v39, %s2254_s19 }
 0x225   :  { %257 = vrot.lane.b32.xlu1 %v2349_v39, %s2255_s20 }
 0x287   :  { %v2361_v42 = vpop.permute.xlu1 %170 }
 0x288   :  { %409 = vrot.lane.b32.xlu1 %v2361_v42, %s2255_s20  ;;  %v2364_v43 = vpop.permute.xlu0 %168 }
 0x289   :  { %333 = vrot.lane.b32.xlu0 %v2364_v43, %s2255_s20 }
 0x28b   :  { %v2367_v44 = vpop.permute.xlu1 %172 }
 0x28c   :  { %v2369_v45 = vpop.permute.xlu0 %176 }
 0x28d   :  { %485 = vrot.lane.b32.xlu0 %v2367_v44, %s2255_s20 }
 0x28f   :  { %v2372_v46 = vpop.permute.xlu1 %174 }
 0x290   :  { %561 = vrot.lane.b32.xlu1 %v2372_v46, %s2255_s20  ;;  %v181_v47 = vpop.permute.xlu0 %180 }
 0x291   :  { %637 = vrot.lane.b32.xlu0 %v2369_v45, %s2255_s20  ;;  %1978 = vmatpush3.xpose.msk.msra.mxu1 %vm182_vm2, %v181_v47 }
 0x292   :  { %1982 = vmatprep.subr.mxu1 %v2250_v37 }
 0x293   :  { %v2378_v48 = vpop.permute.xlu1 %178 }
 0x294   :  { %713 = vrot.lane.b32.xlu1 %v2378_v48, %s2255_s20  ;;  %1980 = vmatmul.mubr.msk.f32.vlgmr.msra.gmra.mrb[2].mxu1 %vm182_vm2, %v2351_v41 }
 0x295   :  { %1984 = vmatprep.mubr.msk.f32.mxu1 %vm2251_vm1, %v2250_v37 }
 0x297   :  { %v258_v49 = vpop.permute.xlu1 %257 }
 0x298   :  { %1983 = vmatpush3.xpose.msk.msra.mxu1 %vm182_vm2, %v258_v49 }
 0x299   :  { %1992 = vmatprep.subr.mxu1 %v2250_v37 }
 0x29b   :  { %1985 = vmatmul.mubr.msk.f32.vlgmr.msra.gmra.mrb[4].mxu1 %vm182_vm2, %v2349_v39 }
 0x29c   :  { %1994 = vmatprep.mubr.msk.f32.mxu1 %vm2251_vm1, %v2250_v37 }
 0x2fa   :  { %v410_v50 = vpop.permute.xlu1 %409 }
 0x2fb   :  { %1993 = vmatpush3.xpose.msk.msra.mxu1 %vm182_vm2, %v410_v50  ;;  %v334_v51 = vpop.permute.xlu0 %333 }
 0x2fc   :  { %1988 = vmatpush3.xpose.msk.msra.mxu0 %vm182_vm2, %v334_v51  ;;  %2002 = vmatprep.subr.mxu1 %v2250_v37 }
 0x2fd   :  { %1997 = vmatprep.subr.mxu0 %v2250_v37 }
 0x2fe   :  { %1995 = vmatmul.mubr.msk.f32.vlgmr.msra.gmra.mrb[6].mxu1 %vm182_vm2, %v2361_v42 }
 0x2ff   :  { %1990 = vmatmul.mubr.msk.f32.vlgmr.msra.gmra.mrb[0].mxu0 %vm182_vm2, %v2364_v43  ;;  %v486_v52 = vpop.permute.xlu0 %485  ;;  %2004 = vmatprep.mubr.msk.f32.mxu1 %vm2251_vm1, %v2250_v37 }
 0x300   :  { %1998 = vmatpush3.xpose.msk.msra.mxu0 %vm182_vm2, %v486_v52  ;;  %1999 = vmatprep.mubr.msk.f32.mxu0 %vm2251_vm1, %v2250_v37 }
 0x301   :  { %2007 = vmatprep.subr.mxu0 %v2250_v37 }
 0x302   :  { %v562_v53 = vpop.permute.xlu1 %561 }
 0x303   :  { %2000 = vmatmul.mubr.msk.f32.vlgmr.msra.gmra.mrb[2].mxu0 %vm182_vm2, %v2367_v44  ;;  %2003 = vmatpush3.xpose.msk.msra.mxu1 %vm182_vm2, %v562_v53  ;;  %v638_v54 = vpop.permute.xlu0 %637 }
 0x304   :  { %2008 = vmatpush3.xpose.msk.msra.mxu0 %vm182_vm2, %v638_v54  ;;  %2009 = vmatprep.mubr.msk.f32.mxu0 %vm2251_vm1, %v2250_v37 }
 0x305   :  { %2012 = vmatprep.subr.mxu1 %v2250_v37  ;;  %2017 = vmatprep.subr.mxu0 %v2250_v37 }
 0x306   :  { %v714_v55 = vpop.permute.xlu1 %713  ;;  %2005 = vmatmul.mubr.msk.f32.vlgmr.msra.gmra.mrb[8].mxu1 %vm182_vm2, %v2372_v46 }
 0x307   :  { %2010 = vmatmul.mubr.msk.f32.vlgmr.msra.gmra.mrb[4].mxu0 %vm182_vm2, %v2369_v45  ;;  %2013 = vmatpush3.xpose.msk.msra.mxu1 %vm182_vm2, %v714_v55 }
 0x308   :  { %2014 = vmatprep.mubr.msk.f32.mxu1 %vm2251_vm1, %v2250_v37  ;;  %2022 = vmatprep.subr.mxu1 %v2250_v37 }
 0x309   :  { %2019 = vmatprep.mubr.msk.f32.mxu0 %vm2251_vm1, %v2250_v37 }
 0x30a   :  { %2015 = vmatmul.mubr.msk.f32.vlgmr.msra.gmra.mrb[10].mxu1 %vm182_vm2, %v2378_v48 }
 0x30b   :  { %2024 = vmatprep.mubr.msk.f32.mxu1 %vm2251_vm1, %v2250_v37 }
 0x367   :  { %v253_v56 = vpop.f32.mrb[2].mxu1 }
 0x368   :  { %v1981_v57 = vpop.f32.mrb[3].mxu1  ;;  %v789_v58 = vsel %vm182_vm2, %v253_v56, -inf }
 0x369   :  { %790 = vmax.xlane.f32.xlu0 %v789_v58 }
 0x36e   :  { %v329_v59 = vpop.f32.mrb[4].mxu1 }
 0x36f   :  { %v1986_v60 = vpop.f32.mrb[5].mxu1  ;;  %v792_v61 = vsel %vm182_vm2, %v329_v59, -inf }
 0x370   :  { %793 = vmax.xlane.f32.xlu1 %v792_v61 }
 0x3d1   :  { %v481_v62 = vpop.f32.mrb[6].mxu1 }
 0x3d2   :  { %v405_v63 = vpop.f32.mrb[0].mxu0  ;;  %v1996_v2 = vpop.f32.mrb[7].mxu1  ;;  %v798_v3 = vsel %vm182_vm2, %v481_v62, -inf }
 0x3d3   :  { %799 = vmax.xlane.f32.xlu0 %v798_v3  ;;  %v1991_v4 = vpop.f32.mrb[1].mxu0  ;;  %v795_v6 = vsel %vm182_vm2, %v405_v63, -inf }
 0x3d6   :  { %v557_v5 = vpop.f32.mrb[2].mxu0 }
 0x3d7   :  { %796 = vmax.xlane.f32.xlu0 %v795_v6  ;;  %v2001_v7 = vpop.f32.mrb[3].mxu0  ;;  %v801_v12 = vsel %vm182_vm2, %v557_v5, -inf }
 0x3d9   :  { %v633_v8 = vpop.f32.mrb[8].mxu1 }
 0x3da   :  { %v2006_v9 = vpop.f32.mrb[9].mxu1  ;;  %v709_v10 = vpop.f32.mrb[4].mxu0  ;;  %v804_v11 = vsel %vm182_vm2, %v633_v8, -inf }
 0x3db   :  { %805 = vmax.xlane.f32.xlu1 %v804_v11  ;;  %802 = vmax.xlane.f32.xlu0 %v801_v12  ;;  %v2011_v13 = vpop.f32.mrb[5].mxu0  ;;  %v807_v17 = vsel %vm182_vm2, %v709_v10, -inf }
 0x3dd   :  { %v785_v14 = vpop.f32.mrb[10].mxu1 }
 0x3de   :  { %v2016_v15 = vpop.f32.mrb[11].mxu1  ;;  %v810_v16 = vsel %vm182_vm2, %v785_v14, -inf }
 0x3df   :  { %811 = vmax.xlane.f32.xlu1 %v810_v16  ;;  %808 = vmax.xlane.f32.xlu0 %v807_v17 }
 0x3f0   :  { %953 = vrot.lane.b32.xlu1 %v2349_v39, %s2256_s21 }
 0x3f4   :  { %1029 = vrot.lane.b32.xlu1 %v2364_v43, %s2256_s21 }
 0x3f5   :  { %877 = vrot.lane.b32.xlu0 %v2351_v41, %s2256_s21 }
 0x3f6   :  { %v791_v18 = vpop.xlane.xlu0 %790 }
 0x3f7   :  { %v813_v19 = vsub.f32 %v253_v56, %v791_v18 }
 0x3f8   :  { %1105 = vrot.lane.b32.xlu1 %v2361_v42, %s2256_s21 }
 0x3f9   :  { %1181 = vrot.lane.b32.xlu0 %v2367_v44, %s2256_s21  ;;  %v821_v20 = vmul.f32 1.442695, %v813_v19 }
 0x3fb   :  { %2186 = vpow2.f32 %v821_v20 }
 0x3fc   :  { %1257 = vrot.lane.b32.xlu1 %v2372_v46, %s2256_s21 }
 0x3fd   :  { %v794_v21 = vpop.xlane.xlu1 %793 }
 0x3fe   :  { %v814_v22 = vsub.f32 %v329_v59, %v794_v21 }
 0x400   :  { %v823_v23 = vmul.f32 1.442695, %v814_v22 }
 0x402   :  { %2188 = vpow2.f32 %v823_v23 }
 0x405   :  { %v2447_v24 = vpop.eup %2186 }
 0x406   :  { %v837_v25 = vsel %vm182_vm2, %v2447_v24, 0.0 }
 0x40c   :  { %v2451_v26 = vpop.eup %2188 }
 0x40d   :  { %v840_v27 = vsel %vm182_vm2, %v2451_v26, 0.0 }
 0x418   :  { %838 = vadd.xlane.f32.xlu0 %v837_v25 }
 0x420   :  { %841 = vadd.xlane.f32.xlu1 %v840_v27 }
 0x460   :  { %v800_v28 = vpop.xlane.xlu0 %799 }
 0x461   :  { %v816_v29 = vsub.f32 %v481_v62, %v800_v28 }
 0x463   :  { %v827_v30 = vmul.f32 1.442695, %v816_v29 }
 0x464   :  { %v797_v31 = vpop.xlane.xlu0 %796 }
 0x465   :  { %2190 = vpow2.f32 %v827_v30  ;;  %v815_v32 = vsub.f32 %v405_v63, %v797_v31 }
 0x467   :  { %v825_v33 = vmul.f32 1.442695, %v815_v32 }
 0x468   :  { %v806_v34 = vpop.xlane.xlu1 %805  ;;  %v803_v35 = vpop.xlane.xlu0 %802 }
 0x469   :  { %2192 = vpow2.f32 %v825_v33  ;;  %v818_v36 = vsub.f32 %v633_v8, %v806_v34  ;;  %v817_v38 = vsub.f32 %v557_v5, %v803_v35  ;;  %v1517_v33 = vld [vmem:[%s2629_s2] sm:$0xff]  ;;  %v1518_v34 = vld [vmem:[%s2629_s2 + $0x8] sm:$0xff] }
 0x46a   :  { %v2122_v35 = vpack.c.bf16 %v1518_v34, %v1517_v33 }
 0x46b   :  { %v831_v39 = vmul.f32 1.442695, %v818_v36  ;;  %v829_v40 = vmul.f32 1.442695, %v817_v38  ;;  %v1520_v36 = vld [vmem:[%s2629_s2 + $0x18] sm:$0xff] }
 0x46c   :  { %v812_v41 = vpop.xlane.xlu1 %811  ;;  %v809_v42 = vpop.xlane.xlu0 %808 }
 0x46d   :  { %2194 = vpow2.f32 %v831_v39  ;;  %v820_v43 = vsub.f32 %v785_v14, %v812_v41  ;;  %v819_v44 = vsub.f32 %v709_v10, %v809_v42 }
 0x46e   :  { %2196 = vpow2.f32 %v829_v40 }
 0x46f   :  { %v2191_v46 = vpop.eup %2190  ;;  %v835_v47 = vmul.f32 1.442695, %v820_v43  ;;  %v833_v49 = vmul.f32 1.442695, %v819_v44 }
 0x470   :  { %v954_v50 = vpop.permute.xlu1 %953  ;;  %v878_v51 = vpop.permute.xlu0 %877  ;;  %v846_v52 = vsel %vm182_vm2, %v2191_v46, 0.0 }
 0x471   :  { %2198 = vpow2.f32 %v835_v47  ;;  %2023 = vmatpush3.msra.mxu1 %v954_v50  ;;  %847 = vadd.xlane.f32.xlu1 %v846_v52 }
 0x472   :  { %2200 = vpow2.f32 %v833_v49  ;;  %2018 = vmatpush3.msra.mxu0 %v878_v51  ;;  %2032 = vmatprep.subr.mxu1 %v2250_v37 }
 0x473   :  { %v2193_v53 = vpop.eup %2192  ;;  %2027 = vmatprep.subr.mxu0 %v2250_v37 }
 0x474   :  { %v843_v54 = vsel %vm182_vm2, %v2193_v53, 0.0  ;;  %v1030_v63 = vpop.permute.xlu1 %1029  ;;  %v1182_v2 = vpop.permute.xlu0 %1181 }
 0x475   :  { %844 = vadd.xlane.f32.xlu0 %v843_v54 }
 0x477   :  { %v2195_v55 = vpop.eup %2194 }
 0x478   :  { %v2197_v56 = vpop.eup %2196  ;;  %v852_v57 = vsel %vm182_vm2, %v2195_v55, 0.0  ;;  %v1106_v3 = vpop.permute.xlu1 %1105 }
 0x479   :  { %853 = vadd.xlane.f32.xlu1 %v852_v57  ;;  %v849_v58 = vsel %vm182_vm2, %v2197_v56, 0.0 }
 0x47a   :  { %850 = vadd.xlane.f32.xlu0 %v849_v58 }
 0x47b   :  { %v2461_v59 = vpop.eup %2198 }
 0x47c   :  { %v2463_v60 = vpop.eup %2200  ;;  %v858_v61 = vsel %vm182_vm2, %v2461_v59, 0.0  ;;  %v1258_v5 = vpop.permute.xlu1 %1257 }
 0x47d   :  { %859 = vadd.xlane.f32.xlu1 %v858_v61  ;;  %v855_v62 = vsel %vm182_vm2, %v2463_v60, 0.0 }
 0x47e   :  { %856 = vadd.xlane.f32.xlu0 %v855_v62 }
 0x48e   :  { %1409 = vrot.lane.b32.xlu1 %v2378_v48, %s2256_s21 }
 0x494   :  { %1333 = vrot.lane.b32.xlu0 %v2369_v45, %s2256_s21 }
 0x4a5   :  { %v839_v4 = vpop.xlane.xlu0 %838 }
 0x4a6   :  { %2202 = vrcp.f32 %v839_v4 }
 0x4ad   :  { %v842_v6 = vpop.xlane.xlu1 %841 }
 0x4ae   :  { %2204 = vrcp.f32 %v842_v6 }
 0x4b0   :  { %v2203_v7 = vpop.eup %2202 }
 0x4b1   :  { %v869_v8 = vmul.f32 %v2203_v7, %v2447_v24 }
 0x4b3   :  { %2020 = vmatmul.mubr.msk.f32.vlgmr.msra.gmra.mrb[6].mxu0 %vm182_vm2, %v869_v8 }
 0x4b4   :  { %2028 = vmatpush3.msra.mxu0 %v1030_v63  ;;  %2029 = vmatprep.mubr.msk.f32.mxu0 %vm2251_vm1, %v2250_v37 }
 0x4b5   :  { %2037 = vmatprep.subr.mxu0 %v2250_v37 }
 0x4b8   :  { %v2205_v45 = vpop.eup %2204 }
 0x4b9   :  { %v870_v48 = vmul.f32 %v2205_v45, %v2451_v26 }
 0x4bb   :  { %2025 = vmatmul.mubr.msk.f32.vlgmr.msra.gmra.mrb[12].mxu1 %vm182_vm2, %v870_v48 }
 0x4bc   :  { %2033 = vmatpush3.msra.mxu1 %v1106_v3  ;;  %2034 = vmatprep.mubr.msk.f32.mxu1 %vm2251_vm1, %v2250_v37  ;;  %v1889_v3 = vld [vmem:[%s2632_s5 + $0x2] ss:$0 sm:$0xff] }
 0x4bd   :  { %2042 = vmatprep.subr.mxu1 %v2250_v37 }
 0x4fe   :  { %v848_v9 = vpop.xlane.xlu1 %847 }
 0x4ff   :  { %2206 = vrcp.f32 %v848_v9 }
 0x502   :  { %v845_v10 = vpop.xlane.xlu0 %844 }
 0x503   :  { %2208 = vrcp.f32 %v845_v10 }
 0x506   :  { %v854_v11 = vpop.xlane.xlu1 %853 }
 0x507   :  { %2210 = vrcp.f32 %v854_v11  ;;  %v851_v12 = vpop.xlane.xlu0 %850 }
 0x508   :  { %2212 = vrcp.f32 %v851_v12 }
 0x509   :  { %v2207_v13 = vpop.eup %2206 }
 0x50a   :  { %v872_v14 = vmul.f32 %v2207_v13, %v2191_v46  ;;  %v860_v15 = vpop.xlane.xlu1 %859 }
 0x50b   :  { %2214 = vrcp.f32 %v860_v15  ;;  %v857_v16 = vpop.xlane.xlu0 %856 }
 0x50c   :  { %2216 = vrcp.f32 %v857_v16  ;;  %2035 = vmatmul.mubr.msk.f32.vlgmr.msra.gmra.mrb[14].mxu1 %vm182_vm2, %v872_v14 }
 0x50d   :  { %v2209_v17 = vpop.eup %2208  ;;  %2043 = vmatpush3.msra.mxu1 %v1258_v5  ;;  %2044 = vmatprep.mubr.msk.f32.mxu1 %vm2251_vm1, %v2250_v37 }
 0x50e   :  { %v871_v18 = vmul.f32 %v2209_v17, %v2193_v53  ;;  %2052 = vmatprep.subr.mxu1 %v2250_v37  ;;  %v1410_v23 = vpop.permute.xlu1 %1409 }
 0x50f   :  { %v1334_v25 = vpop.permute.xlu0 %1333 }
 0x510   :  { %2030 = vmatmul.mubr.msk.f32.vlgmr.msra.gmra.mrb[8].mxu0 %vm182_vm2, %v871_v18  ;;  %v1646_v18 = vld [vmem:[%s2630_s3] sm:$0xff] }
 0x511   :  { %v2211_v19 = vpop.eup %2210  ;;  %2038 = vmatpush3.msra.mxu0 %v1182_v2  ;;  %2039 = vmatprep.mubr.msk.f32.mxu0 %vm2251_vm1, %v2250_v37 }
 0x512   :  { %v2213_v20 = vpop.eup %2212  ;;  %v874_v21 = vmul.f32 %v2211_v19, %v2195_v55  ;;  %2047 = vmatprep.subr.mxu0 %v2250_v37  ;;  %v1647_v19 = vld [vmem:[%s2630_s3 + $0x8] sm:$0xff] }
 0x513   :  { %v873_v22 = vmul.f32 %v2213_v20, %v2197_v56  ;;  %v2130_v20 = vpack.c.bf16 %v1647_v19, %v1646_v18 }
 0x514   :  { %2045 = vmatmul.mubr.msk.f32.vlgmr.msra.gmra.mrb[16].mxu1 %vm182_vm2, %v874_v21  ;;  %v1648_v21 = vld [vmem:[%s2630_s3 + $0x10] sm:$0xff] }
 0x515   :  { %v2215_v24 = vpop.eup %2214  ;;  %2040 = vmatmul.mubr.msk.f32.vlgmr.msra.gmra.mrb[10].mxu0 %vm182_vm2, %v873_v22  ;;  %2053 = vmatpush3.msra.mxu1 %v1410_v23  ;;  %v1649_v22 = vld [vmem:[%s2630_s3 + $0x18] sm:$0xff] }
 0x516   :  { %v2217_v26 = vpop.eup %2216  ;;  %v876_v27 = vmul.f32 %v2215_v24, %v2461_v59  ;;  %2048 = vmatpush3.msra.mxu0 %v1334_v25  ;;  %2049 = vmatprep.mubr.msk.f32.mxu0 %vm2251_vm1, %v2250_v37  ;;  %v2134_v23 = vpack.c.bf16 %v1649_v22, %v1648_v21  ;;  %v1745_v24 = vld [vmem:[%s2631_s4] sm:$0xff]  ;;  %v1746_v25 = vld [vmem:[%s2631_s4 + $0x8] sm:$0xff] }
 0x517   :  { %v875_v28 = vmul.f32 %v2217_v26, %v2463_v60  ;;  %2054 = vmatprep.mubr.msk.f32.mxu1 %vm2251_vm1, %v2250_v37  ;;  %2123 = vmatprep.subr.bf16.mxu1 %v2122_v35  ;;  %v1519_v37 = vld [vmem:[%s2629_s2 + $0x10] sm:$0xff]  ;;  %s2259_s2 = smov 24  }
 0x518   :  { %2055 = vmatmul.mubr.msk.f32.vlgmr.msra.gmra.mrb[18].mxu1 %vm182_vm2, %v876_v27  ;;  %v2126_v38 = vpack.c.bf16 %v1520_v36, %v1519_v37  ;;  %v1747_v26 = vld [vmem:[%s2631_s4 + $0x10] sm:$0xff]  ;;  %v2138_v27 = vpack.c.bf16 %v1746_v25, %v1745_v24 }
 0x519   :  { %2050 = vmatmul.mubr.msk.f32.vlgmr.msra.gmra.mrb[12].mxu0 %vm182_vm2, %v875_v28  ;;  %2125 = vmatpush3.bf16.msra.mxu1 %v2122_v35  ;;  %v1748_v28 = vld [vmem:[%s2631_s4 + $0x18] sm:$0xff] }
 0x51a   :  { %2127 = vmatprep.subr.bf16.mxu1 %v2126_v38  ;;  %2139 = vmatprep.subr.bf16.mxu0 %v2138_v27 }
 0x51b   :  { %2141 = vmatpush3.bf16.msra.mxu0 %v2138_v27 }
 0x51d   :  { %2129 = vmatpush3.bf16.msra.mxu1 %v2126_v38 }
 0x51e   :  { %2131 = vmatprep.subr.bf16.mxu1 %v2130_v20 }
 0x586   :  { %v949_v29 = vpop.f32.mrb[6].mxu0 }
 0x587   :  { %v2021_v30 = vpop.f32.mrb[7].mxu0 }
 0x588   :  { %v1749_v30 = vld [vmem:[%s2631_s4 + $0x20] sm:$0xff] }
 0x58e   :  { %v1025_v31 = vpop.f32.mrb[12].mxu1 }
 0x58f   :  { %v2026_v32 = vpop.f32.mrb[13].mxu1 }
 0x5df   :  { %v1177_v39 = vpop.f32.mrb[14].mxu1 }
 0x5e0   :  { %1489 = vrot.lane.b32.xlu1 %v1177_v39, %s2257_s29  ;;  %v2036_v40 = vpop.f32.mrb[15].mxu1 }
 0x5e1   :  { %v1892_v40 = vld [vmem:[%s2632_s5 + $0x3] ss:$0 sm:$0xff] }
 0x5e3   :  { %v1101_v41 = vpop.f32.mrb[8].mxu0 }
 0x5e4   :  { %1487 = vrot.lane.b32.xlu0 %v1101_v41, %s2257_s29  ;;  %v2031_v42 = vpop.f32.mrb[9].mxu0 }
 0x5e5   :  { %v1893_v42 = vld [vmem:[%s2632_s5 + $0x4] ss:$0 sm:$0xff] }
 0x5e7   :  { %v1329_v43 = vpop.f32.mrb[16].mxu1 }
 0x5e8   :  { %v1253_v44 = vpop.f32.mrb[10].mxu0  ;;  %1497 = vrot.lane.b32.xlu1 %v1329_v43, %s2258_s30  ;;  %v2046_v46 = vpop.f32.mrb[17].mxu1 }
 0x5e9   :  { %1495 = vrot.lane.b32.xlu0 %v1253_v44, %s2258_s30  ;;  %v2041_v47 = vpop.f32.mrb[11].mxu0  ;;  %s2226_s30 = scalar_lea.vmem %s1850_s28, 256 }
 0x5ea   :  { %p2227_p0 = scmp.ne.s32.totalorder %s1850_s28, %s2226_s30  ;;  %p2232_p2 = scmp.lt.s32.totalorder %s2226_s30, %s2226_s30 }
 0x5eb   :  { %v1481_v49 = vpop.f32.mrb[18].mxu1 }
 0x5ec   :  { %v1405_v50 = vpop.f32.mrb[12].mxu0  ;;  %1505 = vrot.lane.b32.xlu1 %v1481_v49, %s2259_s2  ;;  %v2056_v51 = vpop.f32.mrb[19].mxu1  ;;  %p2233_p3 = por %p2232_p2, %p2231_p1 }
 0x5ed   :  { %1503 = vrot.lane.b32.xlu0 %v1405_v50, %s2259_s2  ;;  %v2051_v52 = vpop.f32.mrb[13].mxu0  ;;  %v1751_v51 = vld [vmem:[%s2631_s4 + $0x30] sm:$0xff] }
 0x5ee   :  { %v1752_v52 = vld [vmem:[%s2631_s4 + $0x38] sm:$0xff]  ;;  %p2234_p4 = pnand %p2233_p3, %p2227_p0 }
 0x652   :  { %v1490_v53 = vpop.permute.xlu1 %1489 }
 0x653   :  { %v1510_v57 = vsel %vm182_vm2, %v1025_v31, %v1490_v53  ;;  %v1750_v31 = vld [vmem:[%s2631_s4 + $0x28] sm:$0xff]  ;;  %v2150_v53 = vpack.c.bf16 %v1752_v52, %v1751_v51 }
 0x654   :  { %v2146_v32 = vpack.c.bf16 %v1750_v31, %v1749_v30 }
 0x656   :  { %v1488_v54 = vpop.permute.xlu0 %1487 }
 0x657   :  { %v1509_v58 = vsel %vm182_vm2, %v949_v29, %v1488_v54  ;;  %v2142_v29 = vpack.c.bf16 %v1748_v28, %v1747_v26  ;;  %v1753_v54 = vld [vmem:[%s2631_s4 + $0x40] sm:$0xff] }
 0x659   :  { %2143 = vmatprep.subr.bf16.mxu0 %v2142_v29 }
 0x65a   :  { %v1498_v55 = vpop.permute.xlu1 %1497  ;;  %2145 = vmatpush3.bf16.msra.mxu0 %v2142_v29 }
 0x65b   :  { %v1496_v56 = vpop.permute.xlu0 %1495  ;;  %v1513_v59 = vsel %vm1511_vm3, %v1510_v57, %v1498_v55  ;;  %2147 = vmatprep.subr.bf16.mxu0 %v2146_v32  ;;  %v1754_v55 = vld [vmem:[%s2631_s4 + $0x48] sm:$0xff]  ;;  %v1755_v57 = vld [vmem:[%s2631_s4 + $0x50] sm:$0xff] }
 0x65c   :  { %v1512_v61 = vsel %vm1511_vm3, %v1509_v58, %v1496_v56  ;;  %v2154_v56 = vpack.c.bf16 %v1754_v55, %v1753_v54  ;;  %v1756_v58 = vld [vmem:[%s2631_s4 + $0x58] sm:$0xff] }
 0x65e   :  { %v1506_v60 = vpop.permute.xlu1 %1505  ;;  %2149 = vmatpush3.bf16.msra.mxu0 %v2146_v32 }
 0x65f   :  { %v1516_v62 = vsel %vm1514_vm4, %v1513_v59, %v1506_v60  ;;  %v1504_v63 = vpop.permute.xlu0 %1503  ;;  %2151 = vmatprep.subr.bf16.mxu0 %v2150_v53  ;;  %v2158_v59 = vpack.c.bf16 %v1756_v58, %v1755_v57  ;;  %v1757_v60 = vld [vmem:[%s2631_s4 + $0x60] sm:$0xff] }
 0x660   :  { %v1515_v2 = vsel %vm1514_vm4, %v1512_v61, %v1504_v63  ;;  %v1758_v61 = vld [vmem:[%s2631_s4 + $0x68] sm:$0xff]  ;;  %v1759_v63 = vld [vmem:[%s2631_s4 + $0x70] sm:$0xff] }
 0x661   :  { %2065 = vmatprep.mubr.msk.f32.mxu1 %vm37_vm0, %v1515_v2  ;;  %v1760_v2 = vld [vmem:[%s2631_s4 + $0x78] sm:$0xff] }
 0x662   :  { %2066 = vmatmul.mubr.msk.f32.vlgmr.msra.gmra.mrb[20].mxu1 %vm37_vm0, %v1516_v62  ;;  %2153 = vmatpush3.bf16.msra.mxu0 %v2150_v53  ;;  %v2162_v62 = vpack.c.bf16 %v1758_v61, %v1757_v60 }
 0x663   :  { %2133 = vmatpush3.bf16.msra.mxu1 %v2130_v20  ;;  %2155 = vmatprep.subr.bf16.mxu0 %v2154_v56 }
 0x664   :  { %2135 = vmatprep.subr.bf16.mxu1 %v2134_v23 }
 0x666   :  { %2157 = vmatpush3.bf16.msra.mxu0 %v2154_v56 }
 0x667   :  { %2137 = vmatpush3.bf16.msra.mxu1 %v2134_v23  ;;  %2159 = vmatprep.subr.bf16.mxu0 %v2158_v59 }
 0x66a   :  { %2161 = vmatpush3.bf16.msra.mxu0 %v2158_v59 }
 0x66b   :  { %2163 = vmatprep.subr.bf16.mxu0 %v2162_v62 }
 0x66e   :  { %2165 = vmatpush3.bf16.msra.mxu0 %v2162_v62 }
 0x735   :  { %v2067_v4 = vpop.f32.mrb[20].mxu1 }
 0x736   :  { %v1603_v5 = vadd.f32 %v2067_v4, %v1889_v3  ;;  %v1597_v6 = vpop.f32.mrb[21].mxu1  ;;  %v1894_v4 = vld [vmem:[%s2633_s6] ss:$0 sm:$0xff] }
 0x737   :  { %v1598_v7 = vadd.f32 %v1889_v3, %v1597_v6  ;;  %v2166_v3 = vpack.c.bf16 %v1760_v2, %v1759_v63 }
 0x738   :  { %v2523_v8 = vadd.f32 %v1603_v5, %v2310_v1 }
 0x739   :  { %v2526_v45 = vadd.f32 %v1598_v7, %v2305_v0  ;;  %2167 = vmatprep.subr.bf16.mxu0 %v2166_v3 }
 0x73a   :  { %v1611_v48 = vsel %vm37_vm0, %v2523_v8, 0.0  ;;  %2169 = vmatpush3.bf16.msra.mxu0 %v2166_v3 }
 0x73b   :  { %1612 = vadd.xlane.f32.xlu1 %v1611_v48  ;;  %v1608_v9 = vsel %vm37_vm0, %v2526_v45, 0.0 }
 0x73c   :  { %1609 = vadd.xlane.f32.xlu0 %v1608_v9 }
 0x7c8   :  { %v1613_v10 = vpop.xlane.xlu1 %1612 }
 0x7c9   :  { %v1615_v11 = vmul.f32 0.03125, %v1613_v10  ;;  %v1610_v12 = vpop.xlane.xlu0 %1609 }
 0x7ca   :  { %v1614_v13 = vmul.f32 0.03125, %v1610_v12 }
 0x7cb   :  { %v1617_v14 = vsub.f32 %v2523_v8, %v1615_v11 }
 0x7cc   :  { %v1616_v1 = vsub.f32 %v2526_v45, %v1614_v13 }
 0x7cd   :  { %v1619_v16 = vmul.f32 %v1617_v14, %v1617_v14 }
 0x7ce   :  { %v1618_v15 = vmul.f32 %v1616_v1, %v1616_v1 }
 0x7cf   :  { %v1623_v17 = vsel %vm37_vm0, %v1619_v16, 0.0 }
 0x7d0   :  { %v1620_v0 = vsel %vm37_vm0, %v1618_v15, 0.0 }
 0x7d1   :  { %1621 = vadd.xlane.f32.xlu0 %v1620_v0 }
 0x7d5   :  { %1624 = vadd.xlane.f32.xlu0 %v1623_v17  ;;  %v1897_v17 = vld [vmem:[%s2632_s5 + $0x5] ss:$0 sm:$0xff] }
 0x85e   :  { %v1622_v33 = vpop.xlane.xlu0 %1621 }
 0x85f   :  { %v1626_v34 = vmul.f32 0.03125, %v1622_v33 }
 0x861   :  { %v1628_v35 = vadd.f32 1e-05, %v1626_v34 }
 0x862   :  { %v1625_v37 = vpop.xlane.xlu0 %1624 }
 0x863   :  { %2218 = vrsqrt.f32 %v1628_v35  ;;  %v1627_v36 = vmul.f32 0.03125, %v1625_v37 }
 0x865   :  { %v1629_v38 = vadd.f32 1e-05, %v1627_v36 }
 0x867   :  { %2220 = vrsqrt.f32 %v1629_v38 }
 0x86d   :  { %v2219_v39 = vpop.eup %2218 }
 0x86e   :  { %v1632_v41 = vmul.f32 %v2219_v39, %v1616_v1 }
 0x870   :  { %v1638_v43 = vmul.f32 %v1892_v40, %v1632_v41 }
 0x871   :  { %v2221_v44 = vpop.eup %2220 }
 0x872   :  { %v1633_v46 = vmul.f32 %v2221_v44, %v1617_v14  ;;  %v1644_v47 = vadd.f32 %v1893_v42, %v1638_v43 }
 0x874   :  { %v1639_v49 = vmul.f32 %v1892_v40, %v1633_v46  ;;  %2076 = vmatprep.mubr.msk.f32.mxu1 %vm37_vm0, %v1644_v47 }
 0x876   :  { %v1645_v50 = vadd.f32 %v1893_v42, %v1639_v49 }
 0x878   :  { %2077 = vmatmul.mubr.msk.f32.vlgmr.msra.gmra.mrb[22].mxu1 %vm37_vm0, %v1645_v50 }
 0x94b   :  { %v2078_v5 = vpop.f32.mrb[22].mxu1 }
 0x94c   :  { %v1732_v6 = vadd.f32 %v2078_v5, %v1894_v4  ;;  %v1726_v7 = vpop.f32.mrb[23].mxu1 }
 0x94d   :  { %v1727_v48 = vadd.f32 %v1894_v4, %v1726_v7 }
 0x94e   :  { %v1738_v9 = vmul.f32 0.70710677, %v1732_v6  ;;  %v1736_v15 = vmul.f32 0.5, %v1732_v6 }
 0x94f   :  { %v1737_v10 = vmul.f32 0.70710677, %v1727_v48  ;;  %v1735_v14 = vmul.f32 0.5, %v1727_v48 }
 0x950   :  { %2222 = verf.f32 %v1738_v9 }
 0x951   :  { %2224 = verf.f32 %v1737_v10 }
 0x95a   :  { %v2223_v11 = vpop.eup %2222 }
 0x95b   :  { %v2225_v12 = vpop.eup %2224  ;;  %v1742_v13 = vadd.f32 1.0, %v2223_v11 }
 0x95c   :  { %v1741_v1 = vadd.f32 1.0, %v2225_v12 }
 0x95d   :  { %v1744_v16 = vmul.f32 %v1742_v13, %v1736_v15 }
 0x95e   :  { %v1743_v0 = vmul.f32 %v1741_v1, %v1735_v14 }
 0x960   :  { %2111 = vmatprep.mubr.f32.mxu0 %v1743_v0 }
 0x961   :  { %2112 = vmatmul.mubr.f32.vlgmr.msra.gmra.mrb[14].mxu0 %v1744_v16 }
 0xa34   :  { %v2113_v18 = vpop.f32.mrb[14].mxu0 }
 0xa35   :  { %v1837_v19 = vadd.f32 %v2113_v18, %v1897_v17  ;;  %v1831_v20 = vpop.f32.mrb[15].mxu0 }
 0xa36   :  { %v1832_v21 = vadd.f32 %v1897_v17, %v1831_v20 }
 0xa37   :  { %v1841_v22 = vadd.f32 %v1837_v19, %v2523_v8 }
 0xa38   :  { %v1840_v23 = vadd.f32 %v1832_v21, %v2526_v45 }
 0xa39   :  { %1843 = vst.msk [vmem:[#allocation2 + $0x8] sm:$0xff] %vm37_vm0, %v1841_v22 }
 0xa3a   :  { %1842 = vst.msk [vmem:[#allocation2] sm:$0xff] %vm37_vm0, %v1840_v23 }
 0xa3b   :  { %2237 = shalt.err (!%p2234_p4)
}
 0xa3c   :  { %s2238_s8 = scalar_lea.hbm %s2634_s7, 256 }
 0xa3d   :  { %p2239_p5 = scmp.ne.s32.totalorder %s2634_s7, %s2238_s8  ;;  %p2242_p6 = scmp.lt.u32.totalorder %s2238_s8, %s2634_s7 }
 0xa3f   :  { %p2244_p7 = pnand %p2242_p6, %p2239_p5 }
 0xa41   :  { %2247 = shalt.err (!%p2244_p7)
}
 0xa42   :  { %s2261_s13 = smov 128  }
 0xa43   :  { %1855 = dma.vmem_to_hbm [thread:$0]  %s1850_s28, 256, %s2634_s7, [#allocation3], %s2261_s13, %s2261_s13, %s2257_s29  }
 0xa44   :  { %2248 = dma.done.wait [#allocation3], 256  }
 0xa45   :  { %2249 = vsyncadd [#allocation3], 4294967040 }
 0xa46   :  { %1859 = vsyncpa [#allocation3], 1 }

</bundles_post_ra>
